<compile_context>
chip_gen: v6e
topology: v6e:2x2x1
jax: 0.10.0
libtpu: 0.0.40
codegen_flags: <defaults>
</compile_context>

<pallas_src>
import functools

import jax
import jax.numpy as jnp
from jax import lax
from jax.experimental import pallas as pl
from jax.experimental.pallas import tpu as pltpu


# ----------------------------------------------------------------------------
# Kernels
# ----------------------------------------------------------------------------
def _fused_kernel(x_ref, gamma_ref, beta_ref, o_ref, *, eps, inv_count):
    """Single-slab fast path: stats + normalize in one pass over x."""
    x = x_ref[...].astype(jnp.float32)                     # (1, C, T)
    mean = jnp.sum(x) * inv_count
    var = jnp.maximum(jnp.sum(x * x) * inv_count - mean * mean, 0.0)
    inv_std = lax.rsqrt(var + eps)
    gamma = gamma_ref[...].astype(jnp.float32)              # (C, 1)
    beta = beta_ref[...].astype(jnp.float32)                # (C, 1)
    scale = gamma * inv_std                                  # (C, 1)
    shift = beta - mean * scale                              # (C, 1)
    o_ref[...] = (x * scale[None] + shift[None]).astype(o_ref.dtype)


def _stats_kernel(x_ref, s1_ref, s2_ref, acc1_ref, acc2_ref, *,
                  t_true, tile_t, n_t_per_split, mask_tail):
    """Accumulate sum / sum-of-squares over T tiles.

    CORRECTNESS: the t grid axis (axis 2) must stay "arbitrary" and s1/s2 may
    only be written in the last-t epilogue below (revisited output blocks).
    """
    p = pl.program_id(1)
    t = pl.program_id(2)

    @pl.when(t == 0)
    def _():
        acc1_ref[...] = jnp.zeros_like(acc1_ref)
        acc2_ref[...] = jnp.zeros_like(acc2_ref)

    x = x_ref[...].astype(jnp.float32)                      # (1, C, TT)
    if mask_tail:
        # Ragged tail: lanes beyond the true T hold unspecified data -> zero them.
        start = (p * n_t_per_split + t) * tile_t
        lane = lax.broadcasted_iota(jnp.int32, x.shape, 2)
        x = jnp.where(lane < (t_true - start), x, 0.0)

    # Lane-aligned chunk accumulation: pure VALU adds in the hot loop, the
    # expensive cross-lane/sublane reduce runs only once in the epilogue.
    xc = x[0]                                                # (C, TT)
    lacc = acc1_ref.shape[-1]
    n_chunks = xc.shape[-1] // lacc
    p1 = xc[:, :lacc]
    p2 = p1 * p1
    for j in range(1, n_chunks):
        blk = xc[:, j * lacc:(j + 1) * lacc]
        p1 = p1 + blk
        p2 = p2 + blk * blk
    acc1_ref[...] += p1
    acc2_ref[...] += p2

    @pl.when(t == pl.num_programs(2) - 1)
    def _():
        s1_ref[...] = jnp.sum(acc1_ref[...]).reshape(1, 1, 1, 1)
        s2_ref[...] = jnp.sum(acc2_ref[...]).reshape(1, 1, 1, 1)


def _norm_kernel(x_ref, scale_ref, shift_ref, o_ref):
    """y = x * scale + shift (scale/shift broadcast along T)."""
    # TODO(synk): bf16 fast path on v6e/v7x (skip the f32 round-trip); f32 kept
    # so v5e (no bf16 VPU) stays correct and accuracy matches the reference.
    x = x_ref[...].astype(jnp.float32)                       # (1, C, TT)
    o_ref[...] = (x * scale_ref[...] + shift_ref[...]).astype(o_ref.dtype)


# ----------------------------------------------------------------------------
# Wrapper / dispatch
# ----------------------------------------------------------------------------
def _tpu_vmem_limit_bytes():
    """Generation-aware scoped-VMEM limit (v7x: 64 MiB/TC, v5e/v6e: 128 MiB)."""
    try:
        cap = int(pltpu.get_tpu_info().vmem_capacity_bytes)
    except Exception:
        cap = 64 << 20                      # conservative: assume v7x
    return min((cap * 3) // 4, 112 << 20)


def _choose_time_tile(C, T, budget_bytes, copies, max_tile):
    """Largest lane-dense (multiple-of-128) T-tile whose `copies` buffered f32
    footprint (copies * C * tt * 4 B) fits the budget. Never falls back to
    small exact divisors — ragged tails are masked / clipped instead."""
    cap = budget_bytes // (copies * C * 4)
    cap = min(cap, max_tile)
    if T <= cap:
        return T                            # single full-T tile (full-dim block is legal)
    return max(128, (cap // 128) * 128)


def global_channel_layer_norm(x, gamma=None, beta=None, eps=1e-5, *,
                              fused_max_bytes=None,
                              norm_time_tile=None, stats_time_tile=None):
    """x: (N, C, T); gamma, beta: (C, 1) (or None -> ones/zeros). Returns (N, C, T)."""
    N, C, T = x.shape
    if gamma is None:
        gamma = jnp.ones((C, 1), jnp.float32)
    if beta is None:
        beta = jnp.zeros((C, 1), jnp.float32)
    gamma = gamma.reshape(C, 1)
    beta = beta.reshape(C, 1)

    eps = float(eps)
    inv_count = 1.0 / float(C * T)
    vmem_limit = _tpu_vmem_limit_bytes()
    budget = (vmem_limit * 85) // 100       # headroom for scratch / temporaries

    # ---- Fused single-pass fast path -----------------------------------------
    slab_f32_bytes = C * T * 4
    if fused_max_bytes is None:
        fused_ok = 8 * slab_f32_bytes <= budget   # ~2 in + 2 out dbuf + f32 working set
    else:
        fused_ok = slab_f32_bytes <= fused_max_bytes

    if fused_ok:
        kern = functools.partial(_fused_kernel, eps=eps, inv_count=inv_count)
        return pl.pallas_call(
            kern,
            out_shape=jax.ShapeDtypeStruct((N, C, T), x.dtype),
            grid_spec=pltpu.PrefetchScalarGridSpec(
                num_scalar_prefetch=0,
                grid=(N,),
                in_specs=[
                    pl.BlockSpec((1, C, T), lambda n: (n, 0, 0)),
                    pl.BlockSpec((C, 1), lambda n: (0, 0)),
                    pl.BlockSpec((C, 1), lambda n: (0, 0)),
                ],
                out_specs=pl.BlockSpec((1, C, T), lambda n: (n, 0, 0)),
            ),
            compiler_params=pltpu.CompilerParams(
                dimension_semantics=("parallel",),
                vmem_limit_bytes=vmem_limit),
        )(x, gamma, beta)

    # ---- Pass 1: partial statistics ------------------------------------------
    # Stats pass has no (C, tt) output, so only ~2 buffered input copies count;
    # its tile is ~2x the normalize tile from the same budget.
    tt_s = stats_time_tile if stats_time_tile is not None else _choose_time_tile(
        C, T, budget, copies=2, max_tile=4096)
    n_t_s = pl.cdiv(T, tt_s)
    # Split T over a small leading parallel axis so pass 1 can use both
    # TensorCores on v7x even when N is small (no cost on v5e/v6e).
    P = 2 if (n_t_s % 2 == 0 and n_t_s >= 2) else 1
    n_t_per = n_t_s // P
    mask_tail = (T % tt_s) != 0
    lacc = 128 if (tt_s % 128 == 0) else tt_s

    stats_kern = functools.partial(
        _stats_kernel, t_true=T, tile_t=tt_s, n_t_per_split=n_t_per,
        mask_tail=mask_tail)

    s1p, s2p = pl.pallas_call(
        stats_kern,
        out_shape=(jax.ShapeDtypeStruct((N, P, 1, 1), jnp.float32),
                   jax.ShapeDtypeStruct((N, P, 1, 1), jnp.float32)),
        grid_spec=pltpu.PrefetchScalarGridSpec(
            num_scalar_prefetch=0,
            grid=(N, P, n_t_per),
            in_specs=[
                pl.BlockSpec((1, C, tt_s),
                             lambda n, p, t: (n, 0, p * n_t_per + t)),
            ],
            out_specs=(
                pl.BlockSpec((1, 1, 1, 1), lambda n, p, t: (n, p, 0, 0)),
                pl.BlockSpec((1, 1, 1, 1), lambda n, p, t: (n, p, 0, 0)),
            ),
            scratch_shapes=[pltpu.VMEM((C, lacc), jnp.float32),
                            pltpu.VMEM((C, lacc), jnp.float32)],
        ),
        compiler_params=pltpu.CompilerParams(
            dimension_semantics=("parallel", "parallel", "arbitrary"),
            vmem_limit_bytes=vmem_limit),
    )(x)

    # Tiny finalize in JAX: combine the P partials, build per-batch scale/shift.
    s1 = jnp.sum(s1p, axis=(1, 2, 3))                        # (N,)
    s2 = jnp.sum(s2p, axis=(1, 2, 3))                        # (N,)
    mean = s1 * inv_count
    var = jnp.maximum(s2 * inv_count - mean * mean, 0.0)
    inv_std = lax.rsqrt(var + eps)
    gamma_f = gamma.astype(jnp.float32)[None]                # (1, C, 1)
    beta_f = beta.astype(jnp.float32)[None]                  # (1, C, 1)
    scale = gamma_f * inv_std[:, None, None]                 # (N, C, 1)
    shift = beta_f - mean[:, None, None] * scale             # (N, C, 1)

    # ---- Pass 2: elementwise normalize, fully parallel grid -------------------
    tt_n = norm_time_tile if norm_time_tile is not None else _choose_time_tile(
        C, T, budget, copies=4, max_tile=2048)
    n_t_n = pl.cdiv(T, tt_n)

    y = pl.pallas_call(
        _norm_kernel,
        out_shape=jax.ShapeDtypeStruct((N, C, T), x.dtype),
        grid_spec=pltpu.PrefetchScalarGridSpec(
            num_scalar_prefetch=0,
            grid=(N, n_t_n),
            in_specs=[
                pl.BlockSpec((1, C, tt_n), lambda n, t: (n, 0, t)),
                pl.BlockSpec((1, C, 1), lambda n, t: (n, 0, 0)),
                pl.BlockSpec((1, C, 1), lambda n, t: (n, 0, 0)),
            ],
            out_specs=pl.BlockSpec((1, C, tt_n), lambda n, t: (n, 0, t)),
        ),
        compiler_params=pltpu.CompilerParams(
            dimension_semantics=("parallel", "parallel"),
            vmem_limit_bytes=vmem_limit),
    )(x, scale, shift)
    return y


def reference_glcn(x, gamma, beta, eps=1e-5):
    """Pure-JAX reference matching the PyTorch forward exactly."""
    mean = jnp.mean(x, axis=(1, 2), keepdims=True)
    var = jnp.mean((x - mean) ** 2, axis=(1, 2), keepdims=True)
    return gamma[None] * (x - mean) / jnp.sqrt(var + eps) + beta[None]


if __name__ == "__main__":
    key = jax.random.PRNGKey(0)

    # 1) Small module-shaped test (N x C x T) -> fused single-pass path.
    N, C, T = 2, 4, 16
    x = jax.random.normal(key, (N, C, T), dtype=jnp.float32)
    # Deterministic parameter init matching nn.Module __init__: gamma=ones, beta=zeros.
    gamma = jnp.ones((C, 1), jnp.float32)
    beta = jnp.zeros((C, 1), jnp.float32)
    out = jax.block_until_ready(global_channel_layer_norm(x, gamma, beta, eps=1e-5))
    ref = reference_glcn(x, gamma, beta, eps=1e-5)
    assert out.shape == (N, C, T)
    assert jnp.allclose(out, ref, atol=1e-5, rtol=1e-5), "fused path mismatch"

    # 2) Force the two-pass path: multi-tile reduction, T divisible by the tile.
    x2 = jax.random.normal(jax.random.PRNGKey(1), (2, 8, 384), dtype=jnp.float32)
    g2 = 0.5 + jax.random.uniform(jax.random.PRNGKey(2), (8, 1), dtype=jnp.float32)
    b2 = 0.1 * jax.random.normal(jax.random.PRNGKey(3), (8, 1), dtype=jnp.float32)
    out2 = jax.block_until_ready(global_channel_layer_norm(
        x2, g2, b2, eps=1e-5, fused_max_bytes=0,
        norm_time_tile=128, stats_time_tile=128))
    assert jnp.allclose(out2, reference_glcn(x2, g2, b2), atol=1e-4, rtol=1e-4), \
        "two-pass (divisible) mismatch"

    # 3) Two-pass path with ragged T: masked tail (no host pad / output slice)
    #    and the P=2 split of the stats sweep (cdiv(200,128)=2 tiles).
    x3 = jax.random.normal(jax.random.PRNGKey(4), (2, 8, 200), dtype=jnp.float32)
    out3 = jax.block_until_ready(global_channel_layer_norm(
        x3, g2, b2, eps=1e-5, fused_max_bytes=0,
        norm_time_tile=128, stats_time_tile=128))
    assert out3.shape == (2, 8, 200)
    assert jnp.allclose(out3, reference_glcn(x3, g2, b2), atol=1e-4, rtol=1e-4), \
        "two-pass (ragged) mismatch"

    print("KERNEL_OK")
</pallas_src>

<mosaic_0001>
module attributes {stable_mosaic.version = 11 : i64} {
  func.func @_fused_kernel(%arg0: i32, %arg1: memref<1x4x16xf32, #tpu.memory_space<vmem>>, %arg2: memref<4x1xf32, #tpu.memory_space<vmem>>, %arg3: memref<4x1xf32, #tpu.memory_space<vmem>>, %arg4: memref<1x4x16xf32, #tpu.memory_space<vmem>>) attributes {dimension_semantics = [#tpu.dimension_semantics<parallel>], iteration_bounds = array<i64: 2>, scalar_prefetch = 0 : i64, scratch_operands = 0 : i64, tpu.core_type = #tpu.core_type<tc>, window_params = [{transform_indices = @transform_0, window_bounds = array<i64: 1, 4, 16>}, {pipeline_mode = #tpu.pipeline_mode<synchronous>, transform_indices = @transform_1, window_bounds = array<i64: 4, 1>}, {pipeline_mode = #tpu.pipeline_mode<synchronous>, transform_indices = @transform_2, window_bounds = array<i64: 4, 1>}, {transform_indices = @transform_3, window_bounds = array<i64: 1, 4, 16>}]} {
    %c0 = arith.constant 0 : index
    %c0_0 = arith.constant 0 : index
    %c0_1 = arith.constant 0 : index
    %0 = vector.load %arg1[%c0, %c0_0, %c0_1] : memref<1x4x16xf32, #tpu.memory_space<vmem>>, vector<1x4x16xf32>
    %1 = vector.shape_cast %0 : vector<1x4x16xf32> to vector<1x1x4x16xf32>
    %cst = arith.constant dense<0.000000e+00> : vector<1xf32>
    %2 = vector.multi_reduction <add>, %1, %cst [1, 2, 3] : vector<1x1x4x16xf32> to vector<1xf32>
    %3 = vector.shape_cast %2 : vector<1xf32> to vector<1x1x1x1xf32>
    %4 = vector.extract %3[0, 0, 0, 0] : f32 from vector<1x1x1x1xf32>
    %cst_2 = arith.constant 1.562500e-02 : f32
    %5 = arith.mulf %4, %cst_2 : f32
    %6 = arith.mulf %0, %0 : vector<1x4x16xf32>
    %7 = vector.shape_cast %6 : vector<1x4x16xf32> to vector<1x1x4x16xf32>
    %cst_3 = arith.constant dense<0.000000e+00> : vector<1xf32>
    %8 = vector.multi_reduction <add>, %7, %cst_3 [1, 2, 3] : vector<1x1x4x16xf32> to vector<1xf32>
    %9 = vector.shape_cast %8 : vector<1xf32> to vector<1x1x1x1xf32>
    %10 = vector.extract %9[0, 0, 0, 0] : f32 from vector<1x1x1x1xf32>
    %cst_4 = arith.constant 1.562500e-02 : f32
    %11 = arith.mulf %10, %cst_4 : f32
    %12 = arith.mulf %5, %5 : f32
    %13 = arith.subf %11, %12 : f32
    %cst_5 = arith.constant 0.000000e+00 : f32
    %14 = arith.maximumf %13, %cst_5 : f32
    %cst_6 = arith.constant 9.99999974E-6 : f32
    %15 = arith.addf %14, %cst_6 : f32
    %16 = math.rsqrt %15 : f32
    %c0_7 = arith.constant 0 : index
    %c0_8 = arith.constant 0 : index
    %17 = vector.load %arg2[%c0_7, %c0_8] : memref<4x1xf32, #tpu.memory_space<vmem>>, vector<4x1xf32>
    %c0_9 = arith.constant 0 : index
    %c0_10 = arith.constant 0 : index
    %18 = vector.load %arg3[%c0_9, %c0_10] : memref<4x1xf32, #tpu.memory_space<vmem>>, vector<4x1xf32>
    %19 = vector.broadcast %16 : f32 to vector<4x1xf32>
    %20 = arith.mulf %17, %19 : vector<4x1xf32>
    %21 = vector.broadcast %5 : f32 to vector<4x1xf32>
    %22 = arith.mulf %21, %20 : vector<4x1xf32>
    %23 = arith.subf %18, %22 : vector<4x1xf32>
    %24 = vector.shape_cast %20 : vector<4x1xf32> to vector<1x4x1xf32>
    %25 = vector.broadcast %24 : vector<1x4x1xf32> to vector<1x4x16xf32>
    %26 = arith.mulf %0, %25 : vector<1x4x16xf32>
    %27 = vector.shape_cast %23 : vector<4x1xf32> to vector<1x4x1xf32>
    %28 = vector.broadcast %27 : vector<1x4x1xf32> to vector<1x4x16xf32>
    %29 = arith.addf %26, %28 : vector<1x4x16xf32>
    %c0_11 = arith.constant 0 : index
    %c0_12 = arith.constant 0 : index
    %c0_13 = arith.constant 0 : index
    %30 = vector.load %arg4[%c0_11, %c0_12, %c0_13] : memref<1x4x16xf32, #tpu.memory_space<vmem>>, vector<1x4x16xf32>
    tpu.vector_store %arg4[%c0_11, %c0_12, %c0_13], %29 {strides = array<i32>} : memref<1x4x16xf32, #tpu.memory_space<vmem>>, vector<1x4x16xf32>,
    return
  }
  func.func @transform_0(%arg0: i32) -> (i32, i32, i32) {
    %c0_i32 = arith.constant 0 : i32
    %c0_i32_0 = arith.constant 0 : i32
    %c0_i32_1 = arith.constant 0 : i32
    return %arg0, %c0_i32, %c0_i32_0 : i32, i32, i32
  }
  func.func @transform_1(%arg0: i32) -> (i32, i32) {
    %c0_i32 = arith.constant 0 : i32
    %c0_i32_0 = arith.constant 0 : i32
    %c0_i32_1 = arith.constant 0 : i32
    return %c0_i32, %c0_i32_0 : i32, i32
  }
  func.func @transform_2(%arg0: i32) -> (i32, i32) {
    %c0_i32 = arith.constant 0 : i32
    %c0_i32_0 = arith.constant 0 : i32
    %c0_i32_1 = arith.constant 0 : i32
    return %c0_i32, %c0_i32_0 : i32, i32
  }
  func.func @transform_3(%arg0: i32) -> (i32, i32, i32) {
    %c0_i32 = arith.constant 0 : i32
    %c0_i32_0 = arith.constant 0 : i32
    %c0_i32_1 = arith.constant 0 : i32
    return %arg0, %c0_i32, %c0_i32_0 : i32, i32, i32
  }
}

</mosaic_0001>

<bundles_post_ra>
// kernel: tpu_custom_call.1
= control target key start
LH: loop header
LB: loop body
LE: loop exit
PB: predicated region body
PF: predicated region fallthrough
CT: control target
= control target key end

     0   :  { %8 = vsyncpa [#allocation3], 0  ;;  %s533_s0 = inlined_call_operand.vmem [shape: f32[2,4,16], index: 0, kind: input, shape index: {}]   ;;  %s534_s1 = inlined_call_operand.vmem [shape: f32[4,1], index: 1, kind: input, shape index: {}]   ;;  %s535_s2 = inlined_call_operand.vmem [shape: f32[4,1], index: 2, kind: input, shape index: {}]   ;;  %s536_s3 = inlined_call_operand.hbm [shape: f32[2,4,16], index: 3, kind: output, shape index: {}]  }
   0x1   :  { %10 = vsyncpa [#allocation3 + $0x1], 0  ;;  %s437_s12 = smov 0   ;;  %s439_s13 = smov 0  }
   0x2   :  { %s441_s14 = smov 0   ;;  %s443_s15 = smov 0  }
   0x3 LB: > { %s458_s16 = sadd.s32 4294967295, %s412_s15   ;;  %s291_s17 = sadd.s32 4294967294, %s412_s15   ;;  %s412_s15 = sphi %s443_s15, %s542_s15   ;;  %s408_s14 = sphi %s441_s14, %s541_s14   ;;  %s404_s13 = sphi %s439_s13, %s540_s13   ;;  %s400_s12 = sphi %s437_s12, %s539_s12  }
   0x4   : > { %s462_s18 = sadd.s32 1, %s412_s15   ;;  %s91_s19 = sadd.s32 1, %s408_s14 }
   0x5   : > { %s88_s20 = ssub.s32 %s412_s15, %s462_s18  ;;  %p101_p0 = scmp.ne.s32.totalorder %s408_s14, %s404_s13 }
   0x6   : > { %p89_p1 = scmp.eq.s32.totalorder %s88_s20, 0  ;;  %p102_p2 = scmp.eq.s32.totalorder %s458_s16, 1 }
   0x7   : > { %p107_p3 = scmp.ne.s32.totalorder %s404_s13, %s400_s12  ;;  %p108_p4 = scmp.eq.s32.totalorder %s291_s17, 1 }
   0x8   : > { %s473_s21 = scalar_select %p89_p1, %s408_s14, %s91_s19  }
   0x9   : > { %p475_p5 = por %p102_p2, %p101_p0  ;;  %p479_p6 = por %p108_p4, %p107_p3 }
   0xa   : > { %p294_p7 = scmp.ge.s32.totalorder %s412_s15, 1  ;;  %p139_p8 = scmp.lt.s32.totalorder %s412_s15, 3 }
   0xc   : > { %p140_p9 = pnand %p294_p7, %p139_p8 }
   0xd   : > { %p162_p10 = scmp.lt.s32.totalorder (!%p140_p9), %s458_s16, 1  ;;  %s415_s8 = smov (!%p140_p9), 0.0  }
   0xe   : > { %143 = sbr.rel (%p140_p9) target bundleno = 447 (0x1bf), region = 32  ;;  %s298_s27 = sshll.u32 (!%p140_p9), %s458_s16, 6 }
  0x13   : > { %s163_s24 = scalar_select %p162_p10, %s458_s16, 1  ;;  %vm167_vm0 = vcmask 125952   ;;  %v414_v17 = vmov 0   ;;  %v198_v21 = vld [vmem:[%s534_s1] sm:$0xf] }
  0x14   : > { %348 = vset.pattern.permute.xlu1 %v414_v17  ;;  %349 = vset.pattern.permute.xlu0 %v414_v17  ;;  %v199_v25 = vld [vmem:[%s535_s2] sm:$0xf] }
  0x15   : > { %s296_s25 = sshll.u32 %s163_s24, 2 }
  0x16   : > { %s165_s28 = scalar_lea.vmem %s533_s0, %s296_s25  ;;  %s159_s25 = sand.u32 1, %s404_s13  }
  0x17   : > { %v166_v0 = vld [vmem:[%s165_s28] sm:$0xf]  ;;  %s295_s26 = sshll.u32 %s159_s25, 2 }
  0x18   : > { %v168_v1 = vsel %vm167_vm0, %v166_v0, 0.0  ;;  %v179_v2 = vmul.f32 %v166_v0, %v166_v0  ;;  %s161_s28 = scalar_lea.vmem [#allocation2], %s295_s26 }
  0x19   : > { %169 = vadd.xlane.f32.xlu0 %v168_v1 }
  0x1a   : > { %v180_v3 = vsel %vm167_vm0, %v179_v2, 0.0 }
  0x1d   : > { %181 = vadd.xlane.f32.xlu0 %v180_v3 }
  0xa2   : > { %v170_v4 = vpop.xlane.xlu0 %169 }
  0xa3   : > { %v171_v5 = vrot.slane %v170_v4, 4 }
  0xa5   : > { %v172_v6 = vadd.f32 %v171_v5, %v170_v4 }
  0xa6   : > { %v182_v7 = vpop.xlane.xlu0 %181 }
  0xa7   : > { %v173_v8 = vrot.slane %v172_v6, 2  ;;  %v183_v9 = vrot.slane %v182_v7, 4 }
  0xa9   : > { %v184_v10 = vadd.f32 %v183_v9, %v182_v7  ;;  %v174_v11 = vadd.f32 %v173_v8, %v172_v6 }
  0xab   : > { %v185_v12 = vrot.slane %v184_v10, 2  ;;  %v175_v13 = vrot.slane %v174_v11, 1 }
  0xad   : > { %v186_v14 = vadd.f32 %v185_v12, %v184_v10  ;;  %v176_v15 = vadd.f32 %v175_v13, %v174_v11 }
  0xaf   : > { %301 = vpush %v176_v15  ;;  %v187_v16 = vrot.slane %v186_v14, 1 }
  0xb1   : > { %v188_v18 = vadd.f32 %v187_v16, %v186_v14 }
  0xb3   : > { %303 = vpush %v188_v18 }
  0xe0   : > { %s302_s29 = spop %301 }
  0xe1   : > { %s178_s30 = smul.f32 0.015625, %s302_s29  ;;  %s232_s29 = sshll.u32 %s161_s28, 4  ;;  %s233_s29 = int_to_ptr.vmem [resolvable:$true] %s232_s29 }
  0xe3   : > { %s191_s4 = smul.f32 %s178_s30, %s178_s30  ;;  %v202_v24 = vstv %s178_s30 }
  0xe4   : > { %s304_s5 = spop %303 }
  0xe5   : > { %s190_s6 = smul.f32 0.015625, %s304_s5  ;;  %s230_s5 = scalar_lea.hbm %s536_s3, %s298_s27 }
  0xe7   : > { %s192_s7 = ssub.f32 %s190_s6, %s191_s4  ;;  %s219_s6 = scalar_lea.sflag [#allocation3], %s159_s25 }
  0xe9   : > { %s193_s9 = smax.f32 %s415_s8, %s192_s7  ;;  %s352_s7 = scalar_lea.vmem %s233_s29, 64 }
  0xea   : > { %s194_s10 = sadd.f32 1e-05, %s193_s9  ;;  %p353_p11 = scmp.ne.s32.totalorder %s233_s29, %s352_s7 }
  0xeb   : > { %s416_s8 = smov [#allocation2]  }
  0xec   : > { %v195_v19 = vstv %s194_s10  ;;  %p354_p12 = pnand %p353_p11, %p475_p5  ;;  %s356_s16 = sshll.u32 %s416_s8, 4  ;;  %s357_s16 = int_to_ptr.vmem [resolvable:$false] %s356_s16 }
  0xed   : > { %350 = vrsqrt.f32 %v195_v19  ;;  %s358_s9 = scalar_lea.vmem %s357_s16, 128  ;;  %p359_p0 = scmp.lt.s32.totalorder %s233_s29, %s357_s16 }
  0xee   : > { %p355_p13 = pneg %p354_p12  ;;  %p360_p1 = scmp.lt.s32.totalorder %s358_s9, %s352_s7 }
  0xf0   : > { %p361_p2 = por %p360_p1, %p359_p0 }
  0xf2   : > { %p362_p3 = pnand %p361_p2, %p355_p13 }
  0xfa   : > { %v351_v20 = vpop.eup %350 }
  0xfb   : > { %305 = vpush %v351_v20 }
 0x12c   : > { %s306_s19 = spop %305 }
 0x12d   : > { %v200_v22 = vstv %s306_s19 }
 0x12e   : > { %v201_v23 = vmul.f32 %v200_v22, %v198_v21 }
 0x130   : > { %v203_v26 = vmul.f32 %v202_v24, %v201_v23  ;;  %207 = vperm.xlu1 %348, %v201_v23  }
 0x132   : > { %v204_v27 = vsub.f32 %v199_v25, %v203_v26 }
 0x134   : > { %213 = vperm.xlu1 %348, %v204_v27  }
 0x1ab   : > { %v208_v28 = vpop.permute.xlu1 %207 }
 0x1ac   : > { %v210_v29 = vmul.f32 %v208_v28, %v166_v0 }
 0x1af   : > { %v214_v30 = vpop.permute.xlu1 %213 }
 0x1b0   : > { %v216_v31 = vadd.f32 %v214_v30, %v210_v29 }
 0x1b2   : > { %217 = vst.msk [vmem:[%s161_s28] sm:$0xf] %vm167_vm0, %v216_v31 }
 0x1b3   : > { %365 = shalt.err (!%p362_p3)
}
 0x1b4   : > { %s366_s10 = scalar_lea.hbm %s230_s5, 64  ;;  %s370_s19 = scalar_lea.hbm %s536_s3, 128 }
 0x1b5   : > { %p367_p4 = scmp.ne.s32.totalorder %s230_s5, %s366_s10  ;;  %p371_p9 = scmp.lt.s32.totalorder %s230_s5, %s536_s3 }
 0x1b6   : > { %p372_p10 = scmp.lt.s32.totalorder %s370_s19, %s366_s10 }
 0x1b7   : > { %p368_p7 = pnand %p367_p4, %p475_p5 }
 0x1b8   : > { %p373_p11 = por %p372_p10, %p371_p9 }
 0x1b9   : > { %p369_p8 = pneg %p368_p7 }
 0x1bb   : > { %p374_p12 = pnand %p373_p11, %p369_p8 }
 0x1bd   : > { %377 = shalt.err (!%p374_p12)
}
 0x1be   : > { %307 = dma.vmem_to_hbm [thread:$0]  (%p475_p5), %s233_s29, 64, %s230_s5, %s219_s6  }
 0x1bf PF: > { %p313_p13 = scmp.ge.s32.totalorder %s412_s15, 2  ;;  %s244_s25 = sand.u32 1, %s400_s12  }
 0x1c0   : > { %s245_s26 = scalar_lea.sflag [#allocation3], %s244_s25 }
 0x1c1   : > { %p310_p0 = pnand %p313_p13, %p479_p6 }
 0x1c3   : > { %p311_p1 = pneg %p310_p0 }
 0x1c5   : > { %395 = dma.done.wait (%p311_p1), %s245_s26, 64  }
 0x1c6   : > { %397 = vsyncadd (%p311_p1), %s245_s26, 4294967232  ;;  %p13_p2 = scmp.ge.s32.totalorder %s462_s18, 4   ;;  %s539_s12 = smov %s404_s13 }
 0x1c7   : > { %s540_s13 = smov %s408_s14  ;;  %s541_s14 = smov %s473_s21 }
 0x1c8   : > { %s542_s15 = smov %s462_s18  ;;  %15 = sbr.rel (!%p13_p2) target bundleno = 3 (0x3), region = 67 }
 0x1cd   :  { %250 = vsyncpa [#allocation3], 1 }
 0x1ce   :  { %252 = vsyncpa [#allocation3 + $0x1], 1 }

</bundles_post_ra>
